<compile_context>
chip_gen: v6e
topology: v6e:2x2x1
jax: 0.10.0
libtpu: 0.0.40
codegen_flags: <defaults>
</compile_context>

<pallas_src>
import math
import jax
import jax.numpy as jnp
from jax import lax
from jax.experimental import pallas as pl
from jax.experimental.pallas import tpu as pltpu


def _round_up(x, m):
    return ((x + m - 1) // m) * m


def roberta_lm_head_kernel(x_ref, dw_ref, db_ref, g_ref, b_ref, pw_ref, pb_ref,
                           o_ref, h_ref):
    # x_ref : (tile_n, E)      dw_ref: (E, E)  torch [out, in] layout
    # db_ref/g_ref/b_ref: (1, E)
    # pw_ref: (tile_v, E)      torch [V, E] layout, tiled on V
    # pb_ref: (1, tile_v)      o_ref : (tile_n, tile_v)
    # h_ref : (tile_n, E) f32 VMEM scratch, persists across the inner V axis.

    # Compute dense + gelu + layernorm only once per row tile (first V tile),
    # then reuse the cached `h` for every vocab tile.
    @pl.when(pl.program_id(1) == 0)
    def _():
        x = x_ref[...].astype(dw_ref.dtype)
        # dense: x @ dense_w.T   (contract on the "in" axis of both)
        h = lax.dot_general(
            x, dw_ref[...],
            dimension_numbers=(((1,), (1,)), ((), ())),
            preferred_element_type=jnp.float32,
        )
        h = h + db_ref[...].astype(jnp.float32)

        # exact (erf) gelu, matches torch.nn.functional.gelu default
        h = 0.5 * h * (1.0 + lax.erf(h * (1.0 / math.sqrt(2.0))))

        # layer norm over the embed axis, eps = 1e-5, f32 math
        mean = jnp.mean(h, axis=-1, keepdims=True)
        var = jnp.mean((h - mean) * (h - mean), axis=-1, keepdims=True)
        h = (h - mean) * lax.rsqrt(var + 1e-5)
        h = h * g_ref[...].astype(jnp.float32) + b_ref[...].astype(jnp.float32)

        h_ref[...] = h

    # vocab projection for this V tile: h @ proj_w_tile.T + bias_tile
    pw = pw_ref[...]
    h = h_ref[...].astype(pw.dtype)       # bf16 matmul if weights are bf16
    out = lax.dot_general(
        h, pw,
        dimension_numbers=(((1,), (1,)), ((), ())),
        preferred_element_type=jnp.float32,
    )
    out = out + pb_ref[...].astype(jnp.float32)
    o_ref[...] = out.astype(o_ref.dtype)


def roberta_lm_head(features, dense_w, dense_b, ln_g, ln_b, proj_w, proj_b,
                    *, tile_n=256, tile_v=1024):
    """features: [N, E]; dense_w: [E, E] (torch out x in); proj_w: [V, E]
    (torch layout, shared embedding). Returns logits [N, V].

    Weights / activations may be f32 or bf16; matmuls accumulate in f32.
    """
    N, E = features.shape
    V = proj_w.shape[0]

    # Clamp tiles to the (padded) problem size; keep sublane / lane alignment.
    tile_n = min(tile_n, _round_up(N, 8))      # multiple of 8 (f32 sublane)
    tile_v = min(tile_v, _round_up(V, 128))    # multiple of 128 (lane-dense out)
    n_pad = _round_up(N, tile_n)
    v_pad = _round_up(V, tile_v)

    if n_pad != N:
        features = jnp.pad(features, ((0, n_pad - N), (0, 0)))
    if v_pad != V:
        proj_w = jnp.pad(proj_w, ((0, v_pad - V), (0, 0)))
        proj_b = jnp.pad(proj_b, (0, v_pad - V))

    db = dense_b.reshape(1, E)
    g = ln_g.reshape(1, E)
    b = ln_b.reshape(1, E)
    pb = proj_b.reshape(1, v_pad)

    grid = (n_pad // tile_n, v_pad // tile_v)   # V innermost -> h reused

    out = pl.pallas_call(
        roberta_lm_head_kernel,
        out_shape=jax.ShapeDtypeStruct((n_pad, v_pad), features.dtype),
        grid=grid,
        in_specs=[
            pl.BlockSpec((tile_n, E), lambda i, j: (i, 0)),   # features row tile
            pl.BlockSpec((E, E), lambda i, j: (0, 0)),        # dense weight (resident)
            pl.BlockSpec((1, E), lambda i, j: (0, 0)),        # dense bias
            pl.BlockSpec((1, E), lambda i, j: (0, 0)),        # ln gamma
            pl.BlockSpec((1, E), lambda i, j: (0, 0)),        # ln beta
            pl.BlockSpec((tile_v, E), lambda i, j: (j, 0)),   # proj weight, streamed on V
            pl.BlockSpec((1, tile_v), lambda i, j: (0, j)),   # proj bias tile
        ],
        out_specs=pl.BlockSpec((tile_n, tile_v), lambda i, j: (i, j)),
        scratch_shapes=[pltpu.VMEM((tile_n, E), jnp.float32)],  # cached h
        compiler_params=pltpu.CompilerParams(
            dimension_semantics=("parallel", "arbitrary"),
            vmem_limit_bytes=48 * 1024 * 1024,
        ),
    )(features, dense_w, db, g, b, proj_w, pb)

    return out[:N, :V]


def _reference(features, dense_w, dense_b, ln_g, ln_b, proj_w, proj_b):
    x = features @ dense_w.T + dense_b
    x = 0.5 * x * (1.0 + lax.erf(x / jnp.sqrt(2.0)))
    m = jnp.mean(x, axis=-1, keepdims=True)
    v = jnp.mean((x - m) ** 2, axis=-1, keepdims=True)
    x = (x - m) * lax.rsqrt(v + 1e-5) * ln_g + ln_b
    return x @ proj_w.T + proj_b


if __name__ == "__main__":
    key = jax.random.PRNGKey(0)
    k1, k2, k3, k4 = jax.random.split(key, 4)

    # ---- test 1: small shapes (batch=2, seq=8, embed_dim=32, vocab=64) ----
    batch, seq, E, V = 2, 8, 32, 64
    N = batch * seq

    features = jax.random.normal(k1, (N, E), dtype=jnp.float32)
    dense_w = 0.02 * jax.random.normal(k2, (E, E), dtype=jnp.float32)   # nn.Linear(E,E).weight
    dense_b = jnp.zeros((E,), dtype=jnp.float32)
    ln_g = jnp.ones((E,), dtype=jnp.float32)
    ln_b = jnp.zeros((E,), dtype=jnp.float32)
    proj_w = 0.02 * jax.random.normal(k3, (V, E), dtype=jnp.float32)    # shared weight [V, E]
    proj_b = jnp.zeros((V,), dtype=jnp.float32)

    out = roberta_lm_head(features, dense_w, dense_b, ln_g, ln_b, proj_w, proj_b)
    out = jax.block_until_ready(out)
    ref = _reference(features, dense_w, dense_b, ln_g, ln_b, proj_w, proj_b)
    assert out.shape == (N, V)
    assert jnp.allclose(out, ref, atol=1e-4, rtol=1e-4), "mismatch vs reference (test 1)"

    # ---- test 2: exercise multi-tile grid, h-cache reuse, and V padding ----
    batch2, seq2, V2 = 2, 12, 300          # N=24 -> 3 row tiles of 8; V=300 -> pad to 384
    N2 = batch2 * seq2
    features2 = jax.random.normal(k4, (N2, E), dtype=jnp.float32)
    proj_w2 = 0.02 * jax.random.normal(k3, (V2, E), dtype=jnp.float32)
    proj_b2 = 0.01 * jnp.ones((V2,), dtype=jnp.float32)

    out2 = roberta_lm_head(features2, dense_w, dense_b, ln_g, ln_b, proj_w2, proj_b2,
                           tile_n=8, tile_v=128)
    out2 = jax.block_until_ready(out2)
    ref2 = _reference(features2, dense_w, dense_b, ln_g, ln_b, proj_w2, proj_b2)
    assert out2.shape == (N2, V2)
    assert jnp.allclose(out2, ref2, atol=1e-4, rtol=1e-4), "mismatch vs reference (test 2)"

    print("KERNEL_OK")
</pallas_src>

<mosaic_0001>
module attributes {stable_mosaic.version = 11 : i64} {
  func.func @roberta_lm_head_kernel(%arg0: i32, %arg1: i32, %arg2: memref<16x32xf32, #tpu.memory_space<vmem>>, %arg3: memref<32x32xf32, #tpu.memory_space<vmem>>, %arg4: memref<1x32xf32, #tpu.memory_space<vmem>>, %arg5: memref<1x32xf32, #tpu.memory_space<vmem>>, %arg6: memref<1x32xf32, #tpu.memory_space<vmem>>, %arg7: memref<128x32xf32, #tpu.memory_space<vmem>>, %arg8: memref<1x128xf32, #tpu.memory_space<vmem>>, %arg9: memref<16x128xf32, #tpu.memory_space<vmem>>, %arg10: memref<16x32xf32, #tpu.memory_space<vmem>>) attributes {dimension_semantics = [#tpu.dimension_semantics<parallel>, #tpu.dimension_semantics<arbitrary>], iteration_bounds = array<i64: 1, 1>, scalar_prefetch = 0 : i64, scratch_operands = 1 : i64, tpu.core_type = #tpu.core_type<tc>, window_params = [{transform_indices = @transform_0, window_bounds = array<i64: 16, 32>}, {pipeline_mode = #tpu.pipeline_mode<synchronous>, transform_indices = @transform_1, window_bounds = array<i64: 32, 32>}, {pipeline_mode = #tpu.pipeline_mode<synchronous>, transform_indices = @transform_2, window_bounds = array<i64: 1, 32>}, {pipeline_mode = #tpu.pipeline_mode<synchronous>, transform_indices = @transform_3, window_bounds = array<i64: 1, 32>}, {pipeline_mode = #tpu.pipeline_mode<synchronous>, transform_indices = @transform_4, window_bounds = array<i64: 1, 32>}, {transform_indices = @transform_5, window_bounds = array<i64: 128, 32>}, {transform_indices = @transform_6, window_bounds = array<i64: 1, 128>}, {transform_indices = @transform_7, window_bounds = array<i64: 16, 128>}]} {
    %c0_i32 = arith.constant 0 : i32
    %0 = arith.cmpi eq, %arg1, %c0_i32 : i32
    %1 = arith.extui %0 : i1 to i32
    %c0_i32_0 = arith.constant 0 : i32
    %2 = arith.cmpi ne, %1, %c0_i32_0 : i32
    scf.if %2 {
      %c0_8 = arith.constant 0 : index
      %c0_9 = arith.constant 0 : index
      %10 = vector.load %arg2[%c0_8, %c0_9] : memref<16x32xf32, #tpu.memory_space<vmem>>, vector<16x32xf32>
      %c0_10 = arith.constant 0 : index
      %c0_11 = arith.constant 0 : index
      %11 = vector.load %arg3[%c0_10, %c0_11] : memref<32x32xf32, #tpu.memory_space<vmem>>, vector<32x32xf32>
      %cst_12 = arith.constant dense<0.000000e+00> : vector<16x32xf32>
      %12 = tpu.matmul %10, %11, %cst_12 {dimension_numbers = #tpu.dot_dimension_numbers<[1], [1], [0], [0], [0, 0, 1, 0], [], []>} : vector<16x32xf32>, vector<32x32xf32>, vector<16x32xf32> -> vector<16x32xf32>
      %c0_13 = arith.constant 0 : index
      %c0_14 = arith.constant 0 : index
      %13 = vector.load %arg4[%c0_13, %c0_14] : memref<1x32xf32, #tpu.memory_space<vmem>>, vector<1x32xf32>
      %14 = vector.broadcast %13 : vector<1x32xf32> to vector<16x32xf32>
      %15 = arith.addf %12, %14 : vector<16x32xf32>
      %cst_15 = arith.constant 5.000000e-01 : f32
      %16 = vector.broadcast %cst_15 : f32 to vector<16x32xf32>
      %17 = arith.mulf %16, %15 : vector<16x32xf32>
      %cst_16 = arith.constant 0.707106769 : f32
      %18 = vector.broadcast %cst_16 : f32 to vector<16x32xf32>
      %19 = arith.mulf %15, %18 : vector<16x32xf32>
      %20 = math.erf %19 : vector<16x32xf32>
      %cst_17 = arith.constant 1.000000e+00 : f32
      %21 = vector.broadcast %cst_17 : f32 to vector<16x32xf32>
      %22 = arith.addf %21, %20 : vector<16x32xf32>
      %23 = arith.mulf %17, %22 : vector<16x32xf32>
      %cst_18 = arith.constant dense<0.000000e+00> : vector<16xf32>
      %24 = vector.multi_reduction <add>, %23, %cst_18 [1] : vector<16x32xf32> to vector<16xf32>
      %25 = vector.shape_cast %24 : vector<16xf32> to vector<16x1xf32>
      %cst_19 = arith.constant 3.200000e+01 : f32
      %26 = vector.broadcast %cst_19 : f32 to vector<16x1xf32>
      %27 = arith.divf %25, %26 : vector<16x1xf32>
      %28 = vector.broadcast %27 : vector<16x1xf32> to vector<16x32xf32>
      %29 = arith.subf %23, %28 : vector<16x32xf32>
      %30 = vector.broadcast %27 : vector<16x1xf32> to vector<16x32xf32>
      %31 = arith.subf %23, %30 : vector<16x32xf32>
      %32 = arith.mulf %29, %31 : vector<16x32xf32>
      %cst_20 = arith.constant dense<0.000000e+00> : vector<16xf32>
      %33 = vector.multi_reduction <add>, %32, %cst_20 [1] : vector<16x32xf32> to vector<16xf32>
      %34 = vector.shape_cast %33 : vector<16xf32> to vector<16x1xf32>
      %cst_21 = arith.constant 3.200000e+01 : f32
      %35 = vector.broadcast %cst_21 : f32 to vector<16x1xf32>
      %36 = arith.divf %34, %35 : vector<16x1xf32>
      %37 = vector.broadcast %27 : vector<16x1xf32> to vector<16x32xf32>
      %38 = arith.subf %23, %37 : vector<16x32xf32>
      %cst_22 = arith.constant 9.99999974E-6 : f32
      %39 = vector.broadcast %cst_22 : f32 to vector<16x1xf32>
      %40 = arith.addf %36, %39 : vector<16x1xf32>
      %41 = math.rsqrt %40 : vector<16x1xf32>
      %42 = vector.broadcast %41 : vector<16x1xf32> to vector<16x32xf32>
      %43 = arith.mulf %38, %42 : vector<16x32xf32>
      %c0_23 = arith.constant 0 : index
      %c0_24 = arith.constant 0 : index
      %44 = vector.load %arg5[%c0_23, %c0_24] : memref<1x32xf32, #tpu.memory_space<vmem>>, vector<1x32xf32>
      %45 = vector.broadcast %44 : vector<1x32xf32> to vector<16x32xf32>
      %46 = arith.mulf %43, %45 : vector<16x32xf32>
      %c0_25 = arith.constant 0 : index
      %c0_26 = arith.constant 0 : index
      %47 = vector.load %arg6[%c0_25, %c0_26] : memref<1x32xf32, #tpu.memory_space<vmem>>, vector<1x32xf32>
      %48 = vector.broadcast %47 : vector<1x32xf32> to vector<16x32xf32>
      %49 = arith.addf %46, %48 : vector<16x32xf32>
      %c0_27 = arith.constant 0 : index
      %c0_28 = arith.constant 0 : index
      %50 = vector.load %arg10[%c0_27, %c0_28] : memref<16x32xf32, #tpu.memory_space<vmem>>, vector<16x32xf32>
      tpu.vector_store %arg10[%c0_27, %c0_28], %49 {strides = array<i32>} : memref<16x32xf32, #tpu.memory_space<vmem>>, vector<16x32xf32>,
    } else {
    }
    %c0 = arith.constant 0 : index
    %c0_1 = arith.constant 0 : index
    %3 = vector.load %arg7[%c0, %c0_1] : memref<128x32xf32, #tpu.memory_space<vmem>>, vector<128x32xf32>
    %c0_2 = arith.constant 0 : index
    %c0_3 = arith.constant 0 : index
    %4 = vector.load %arg10[%c0_2, %c0_3] : memref<16x32xf32, #tpu.memory_space<vmem>>, vector<16x32xf32>
    %cst = arith.constant dense<0.000000e+00> : vector<16x128xf32>
    %5 = tpu.matmul %4, %3, %cst {dimension_numbers = #tpu.dot_dimension_numbers<[1], [1], [0], [0], [0, 0, 1, 0], [], []>} : vector<16x32xf32>, vector<128x32xf32>, vector<16x128xf32> -> vector<16x128xf32>
    %c0_4 = arith.constant 0 : index
    %c0_5 = arith.constant 0 : index
    %6 = vector.load %arg8[%c0_4, %c0_5] : memref<1x128xf32, #tpu.memory_space<vmem>>, vector<1x128xf32>
    %7 = vector.broadcast %6 : vector<1x128xf32> to vector<16x128xf32>
    %8 = arith.addf %5, %7 : vector<16x128xf32>
    %c0_6 = arith.constant 0 : index
    %c0_7 = arith.constant 0 : index
    %9 = vector.load %arg9[%c0_6, %c0_7] : memref<16x128xf32, #tpu.memory_space<vmem>>, vector<16x128xf32>
    tpu.vector_store %arg9[%c0_6, %c0_7], %8 {strides = array<i32>} : memref<16x128xf32, #tpu.memory_space<vmem>>, vector<16x128xf32>,
    return
  }
  func.func @transform_0(%arg0: i32, %arg1: i32) -> (i32, i32) {
    %c0_i32 = arith.constant 0 : i32
    %c0_i32_0 = arith.constant 0 : i32
    return %arg0, %c0_i32 : i32, i32
  }
  func.func @transform_1(%arg0: i32, %arg1: i32) -> (i32, i32) {
    %c0_i32 = arith.constant 0 : i32
    %c0_i32_0 = arith.constant 0 : i32
    %c0_i32_1 = arith.constant 0 : i32
    return %c0_i32, %c0_i32_0 : i32, i32
  }
  func.func @transform_2(%arg0: i32, %arg1: i32) -> (i32, i32) {
    %c0_i32 = arith.constant 0 : i32
    %c0_i32_0 = arith.constant 0 : i32
    %c0_i32_1 = arith.constant 0 : i32
    return %c0_i32, %c0_i32_0 : i32, i32
  }
  func.func @transform_3(%arg0: i32, %arg1: i32) -> (i32, i32) {
    %c0_i32 = arith.constant 0 : i32
    %c0_i32_0 = arith.constant 0 : i32
    %c0_i32_1 = arith.constant 0 : i32
    return %c0_i32, %c0_i32_0 : i32, i32
  }
  func.func @transform_4(%arg0: i32, %arg1: i32) -> (i32, i32) {
    %c0_i32 = arith.constant 0 : i32
    %c0_i32_0 = arith.constant 0 : i32
    %c0_i32_1 = arith.constant 0 : i32
    return %c0_i32, %c0_i32_0 : i32, i32
  }
  func.func @transform_5(%arg0: i32, %arg1: i32) -> (i32, i32) {
    %c0_i32 = arith.constant 0 : i32
    %c0_i32_0 = arith.constant 0 : i32
    return %arg1, %c0_i32 : i32, i32
  }
  func.func @transform_6(%arg0: i32, %arg1: i32) -> (i32, i32) {
    %c0_i32 = arith.constant 0 : i32
    %c0_i32_0 = arith.constant 0 : i32
    return %c0_i32, %arg1 : i32, i32
  }
  func.func @transform_7(%arg0: i32, %arg1: i32) -> (i32, i32) {
    %c0_i32 = arith.constant 0 : i32
    return %arg0, %arg1 : i32, i32
  }
}

</mosaic_0001>

<bundles_post_ra>
// kernel: tpu_custom_call.1
= control target key start
LH: loop header
LB: loop body
LE: loop exit
PB: predicated region body
PF: predicated region fallthrough
CT: control target
= control target key end

     0   :  { %vm44_vm0 = vcmask 261120   ;;  %s673_s0 = inlined_call_operand.vmem [shape: f32[16,32], index: 0, kind: input, shape index: {}]   ;;  %s674_s1 = inlined_call_operand.vmem [shape: f32[32,32], index: 1, kind: input, shape index: {}]   ;;  %s675_s2 = inlined_call_operand.vmem [shape: f32[1,32], index: 2, kind: input, shape index: {}]   ;;  %s676_s3 = inlined_call_operand.vmem [shape: f32[1,32], index: 3, kind: input, shape index: {}]   ;;  %s677_s4 = inlined_call_operand.vmem [shape: f32[1,32], index: 4, kind: input, shape index: {}]   ;;  %s678_s5 = inlined_call_operand.vmem [shape: f32[128,32], index: 5, kind: input, shape index: {}]   ;;  %s679_s6 = inlined_call_operand.vmem [shape: f32[1,128], index: 6, kind: input, shape index: {}]   ;;  %s680_s7 = inlined_call_operand.hbm [shape: f32[16,128], index: 7, kind: output, shape index: {}]  }
   0x1   :  { %v36_v0 = vld [vmem:[%s674_s1 + $0x18] sm:$0xff]  ;;  %v35_v1 = vld [vmem:[%s674_s1 + $0x10] sm:$0xff]  ;;  %v31_v2 = vld [vmem:[%s673_s0] sm:$0xff] }
   0x2   :  { %420 = vmatprep.subr.msk.mxu0 %vm44_vm0, %v36_v0  ;;  %428 = vmatprep.mubr.msk.f32.mxu0 %vm44_vm0, %v31_v2 }
   0x3   :  { %421 = vmatpush3.xpose.msk.msra.mxu0 %vm44_vm0, %v36_v0 }
   0x4   :  { %12 = vsyncpa [#allocation4], 0  ;;  %422 = vmatprep.subr.msk.mxu0 %vm44_vm0, %v35_v1  ;;  %v34_v3 = vld [vmem:[%s674_s1 + $0x8] sm:$0xff]  ;;  %v33_v4 = vld [vmem:[%s674_s1] sm:$0xff] }
   0x5   :  { %v32_v5 = vld [vmem:[%s673_s0 + $0x8] sm:$0xff]  ;;  %v368_v6 = vld [vmem:[%s675_s2] ss:$0 sm:$0xff]  ;;  %v210_v23 = vld [vmem:[%s678_s5 + $0x78] sm:$0xff] }
   0x6   :  { %v209_v24 = vld [vmem:[%s678_s5 + $0x70] sm:$0xff]  ;;  %431 = vmatprep.subr.msk.mxu1 %vm44_vm0, %v210_v23  ;;  %v208_v25 = vld [vmem:[%s678_s5 + $0x68] sm:$0xff]  ;;  %v207_v26 = vld [vmem:[%s678_s5 + $0x60] sm:$0xff] }
   0x7   :  { %423 = vmatpush3.xpose.msk.msra.mxu0 %vm44_vm0, %v35_v1  ;;  %432 = vmatpush3.xpose.msk.msra.mxu1 %vm44_vm0, %v210_v23  ;;  %v206_v27 = vld [vmem:[%s678_s5 + $0x58] sm:$0xff]  ;;  %v205_v28 = vld [vmem:[%s678_s5 + $0x50] sm:$0xff]  ;;  %v204_v29 = vld [vmem:[%s678_s5 + $0x48] sm:$0xff] }
   0x8   :  { %424 = vmatprep.subr.msk.mxu0 %vm44_vm0, %v34_v3  ;;  %433 = vmatprep.subr.msk.mxu1 %vm44_vm0, %v209_v24  ;;  %v203_v40 = vld [vmem:[%s678_s5 + $0x40] sm:$0xff]  ;;  %v202_v41 = vld [vmem:[%s678_s5 + $0x38] sm:$0xff]  ;;  %v201_v42 = vld [vmem:[%s678_s5 + $0x30] sm:$0xff] }
   0x9   :  { %v200_v43 = vld [vmem:[%s678_s5 + $0x28] sm:$0xff]  ;;  %v199_v44 = vld [vmem:[%s678_s5 + $0x20] sm:$0xff]  ;;  %v198_v45 = vld [vmem:[%s678_s5 + $0x18] sm:$0xff] }
   0xa   :  { %v197_v46 = vld [vmem:[%s678_s5 + $0x10] sm:$0xff]  ;;  %v196_v47 = vld [vmem:[%s678_s5 + $0x8] sm:$0xff]  ;;  %v195_v48 = vld [vmem:[%s678_s5] sm:$0xff] }
   0xb   :  { %425 = vmatpush3.xpose.msk.msra.mxu0 %vm44_vm0, %v34_v3  ;;  %434 = vmatpush3.xpose.msk.msra.mxu1 %vm44_vm0, %v209_v24  ;;  %v375_v56 = vld [vmem:[%s676_s3] ss:$0 sm:$0xff] }
   0xc   :  { %426 = vmatprep.subr.msk.mxu0 %vm44_vm0, %v33_v4  ;;  %435 = vmatprep.subr.msk.mxu1 %vm44_vm0, %v208_v25  ;;  %v376_v58 = vld [vmem:[%s677_s4] ss:$0 sm:$0xff]  ;;  %s499_s4 = smov [#allocation3]  }
   0xd   :  { %v377_v3 = vld [vmem:[%s679_s6] ss:$0 sm:$0xff]  ;;  %s357_s22 = sshll.u32 %s499_s4, 4  ;;  %s358_s22 = int_to_ptr.vmem [resolvable:$true] %s357_s22 }
   0xe   :  { %s477_s23 = scalar_lea.vmem %s358_s22, 256  ;;  %p482_p1 = scmp.lt.s32.totalorder %s358_s22, %s358_s22 }
   0xf   :  { %427 = vmatpush3.xpose.msk.msra.mxu0 %vm44_vm0, %v33_v4  ;;  %436 = vmatpush3.xpose.msk.msra.mxu1 %vm44_vm0, %v208_v25  ;;  %p478_p0 = scmp.ne.s32.totalorder %s358_s22, %s477_s23  ;;  %p483_p2 = scmp.lt.s32.totalorder %s477_s23, %s477_s23 }
  0x10   :  { %437 = vmatprep.subr.msk.mxu1 %vm44_vm0, %v207_v26 }
  0x11   :  { %p484_p3 = por %p483_p2, %p482_p1 }
  0x12   :  { %429 = vmatmul.mubr.msk.f32.vlgmr.msra.gmra.mxu0 %vm44_vm0, %v32_v5 }
  0x13   :  { %438 = vmatpush3.xpose.msk.msra.mxu1 %vm44_vm0, %v207_v26  ;;  %p485_p4 = pnand %p484_p3, %p478_p0 }
  0x14   :  { %439 = vmatprep.subr.msk.mxu1 %vm44_vm0, %v206_v27 }
  0x17   :  { %440 = vmatpush3.xpose.msk.msra.mxu1 %vm44_vm0, %v206_v27 }
  0x18   :  { %441 = vmatprep.subr.msk.mxu1 %vm44_vm0, %v205_v28 }
  0x1b   :  { %442 = vmatpush3.xpose.msk.msra.mxu1 %vm44_vm0, %v205_v28 }
  0x1c   :  { %443 = vmatprep.subr.msk.mxu1 %vm44_vm0, %v204_v29 }
  0x1f   :  { %444 = vmatpush3.xpose.msk.msra.mxu1 %vm44_vm0, %v204_v29 }
  0x20   :  { %445 = vmatprep.subr.msk.mxu1 %vm44_vm0, %v203_v40 }
  0x23   :  { %446 = vmatpush3.xpose.msk.msra.mxu1 %vm44_vm0, %v203_v40 }
  0x24   :  { %447 = vmatprep.subr.msk.mxu1 %vm44_vm0, %v202_v41 }
  0x27   :  { %448 = vmatpush3.xpose.msk.msra.mxu1 %vm44_vm0, %v202_v41 }
  0x28   :  { %449 = vmatprep.subr.msk.mxu1 %vm44_vm0, %v201_v42 }
  0x2b   :  { %450 = vmatpush3.xpose.msk.msra.mxu1 %vm44_vm0, %v201_v42 }
  0x2c   :  { %451 = vmatprep.subr.msk.mxu1 %vm44_vm0, %v200_v43 }
  0x2f   :  { %452 = vmatpush3.xpose.msk.msra.mxu1 %vm44_vm0, %v200_v43 }
  0x30   :  { %453 = vmatprep.subr.msk.mxu1 %vm44_vm0, %v199_v44 }
  0x33   :  { %454 = vmatpush3.xpose.msk.msra.mxu1 %vm44_vm0, %v199_v44 }
  0x34   :  { %455 = vmatprep.subr.msk.mxu1 %vm44_vm0, %v198_v45 }
  0x37   :  { %456 = vmatpush3.xpose.msk.msra.mxu1 %vm44_vm0, %v198_v45 }
  0x38   :  { %457 = vmatprep.subr.msk.mxu1 %vm44_vm0, %v197_v46 }
  0x3b   :  { %458 = vmatpush3.xpose.msk.msra.mxu1 %vm44_vm0, %v197_v46 }
  0x3c   :  { %459 = vmatprep.subr.msk.mxu1 %vm44_vm0, %v196_v47 }
  0x3f   :  { %460 = vmatpush3.xpose.msk.msra.mxu1 %vm44_vm0, %v196_v47 }
  0x40   :  { %461 = vmatprep.subr.msk.mxu1 %vm44_vm0, %v195_v48 }
  0x43   :  { %462 = vmatpush3.xpose.msk.msra.mxu1 %vm44_vm0, %v195_v48 }
  0xd2   :  { %v430_v7 = vpop.f32.mrf.mxu0 }
  0xd3   :  { %v135_v8 = vadd.f32 %v430_v7, %v368_v6 }
  0xd4   :  { %v129_v9 = vpop.f32.mrf.mxu0 }
  0xd5   :  { %v141_v10 = vmul.f32 0.70710677, %v135_v8  ;;  %v130_v11 = vadd.f32 %v368_v6, %v129_v9  ;;  %v139_v18 = vmul.f32 0.5, %v135_v8 }
  0xd7   :  { %469 = verf.f32 %v141_v10  ;;  %v140_v12 = vmul.f32 0.70710677, %v130_v11  ;;  %v138_v15 = vmul.f32 0.5, %v130_v11 }
  0xd9   :  { %471 = verf.f32 %v140_v12 }
  0xe4   :  { %v470_v13 = vpop.eup %469 }
  0xe5   :  { %v145_v17 = vadd.f32 1.0, %v470_v13 }
  0xe6   :  { %v472_v14 = vpop.eup %471 }
  0xe7   :  { %v144_v16 = vadd.f32 1.0, %v472_v14  ;;  %v147_v21 = vmul.f32 %v145_v17, %v139_v18 }
  0xe9   :  { %v146_v19 = vmul.f32 %v144_v16, %v138_v15  ;;  %v151_v22 = vsel %vm44_vm0, %v147_v21, 0.0 }
  0xeb   :  { %v148_v20 = vsel %vm44_vm0, %v146_v19, 0.0 }
  0xec   :  { %149 = vadd.xlane.f32.xlu0 %v148_v20 }
  0xf0   :  { %152 = vadd.xlane.f32.xlu0 %v151_v22 }
 0x175   :  { %v150_v30 = vpop.xlane.xlu0 %149 }
 0x176   :  { %v155_v31 = vmul.f32 0.03125, %v150_v30 }
 0x178   :  { %v157_v32 = vsub.f32 %v146_v19, %v155_v31 }
 0x179   :  { %v153_v33 = vpop.xlane.xlu0 %152 }
 0x17a   :  { %v156_v34 = vmul.f32 0.03125, %v153_v33  ;;  %v159_v35 = vmul.f32 %v157_v32, %v157_v32 }
 0x17c   :  { %v158_v36 = vsub.f32 %v147_v21, %v156_v34  ;;  %v161_v37 = vsel %vm44_vm0, %v159_v35, 0.0 }
 0x17d   :  { %162 = vadd.xlane.f32.xlu1 %v161_v37 }
 0x17e   :  { %v160_v38 = vmul.f32 %v158_v36, %v158_v36 }
 0x180   :  { %v164_v39 = vsel %vm44_vm0, %v160_v38, 0.0 }
 0x181   :  { %165 = vadd.xlane.f32.xlu1 %v164_v39 }
 0x206   :  { %v163_v49 = vpop.xlane.xlu1 %162 }
 0x207   :  { %v167_v50 = vmul.f32 0.03125, %v163_v49 }
 0x209   :  { %v169_v51 = vadd.f32 1e-05, %v167_v50 }
 0x20a   :  { %v166_v52 = vpop.xlane.xlu1 %165 }
 0x20b   :  { %473 = vrsqrt.f32 %v169_v51  ;;  %v168_v53 = vmul.f32 0.03125, %v166_v52 }
 0x20d   :  { %v170_v54 = vadd.f32 1e-05, %v168_v53 }
 0x20f   :  { %475 = vrsqrt.f32 %v170_v54 }
 0x218   :  { %v474_v55 = vpop.eup %473 }
 0x219   :  { %v173_v57 = vmul.f32 %v474_v55, %v157_v32 }
 0x21b   :  { %v182_v59 = vmul.f32 %v375_v56, %v173_v57 }
 0x21c   :  { %v476_v60 = vpop.eup %475 }
 0x21d   :  { %v191_v61 = vadd.f32 %v376_v58, %v182_v59  ;;  %v174_v62 = vmul.f32 %v476_v60, %v158_v36 }
 0x21f   :  { %193 = vst.msk [vmem:[#allocation2] sm:$0xff] %vm44_vm0, %v191_v61  ;;  %v183_v63 = vmul.f32 %v375_v56, %v174_v62 }
 0x221   :  { %v192_v0 = vadd.f32 %v376_v58, %v183_v63 }
 0x223   :  { %194 = vst.msk [vmem:[#allocation2 + $0x8] sm:$0xff] %vm44_vm0, %v192_v0 }
 0x226   :  { %v211_v1 = vld [vmem:[#allocation2] sm:$0xff] }
 0x227   :  { %463 = vmatprep.mubr.msk.f32.mxu1 %vm44_vm0, %v211_v1 }
 0x22a   :  { %v212_v2 = vld [vmem:[#allocation2 + $0x8] sm:$0xff] }
 0x22b   :  { %464 = vmatmul.mubr.msk.f32.vlgmr.msra.gmra.mxu1 %vm44_vm0, %v212_v2 }
 0x2eb   :  { %v465_v4 = vpop.f32.mrf.mxu1 }
 0x2ec   :  { %v347_v5 = vadd.f32 %v465_v4, %v377_v3 }
 0x2ed   :  { %v341_v6 = vpop.f32.mrf.mxu1 }
 0x2ee   :  { %351 = vst [vmem:[#allocation3 + $0x8] sm:$0xff] %v347_v5  ;;  %v342_v7 = vadd.f32 %v377_v3, %v341_v6 }
 0x2f0   :  { %350 = vst [vmem:[#allocation3] sm:$0xff] %v342_v7 }
 0x2f1   :  { %488 = shalt.err (!%p485_p4)
}
 0x2f2   :  { %s500_s24 = smov 128   ;;  %s501_s25 = smov 8  }
 0x2f3   :  { %363 = dma.vmem_to_hbm [thread:$0]  %s358_s22, 256, %s680_s7, [#allocation4], %s500_s24, %s500_s24, %s501_s25  }
 0x2f4   :  { %497 = dma.done.wait [#allocation4], 256  }
 0x2f5   :  { %498 = vsyncadd [#allocation4], 4294967040 }
 0x2f6   :  { %367 = vsyncpa [#allocation4], 1 }

</bundles_post_ra>
